<compile_context>
chip_gen: v7x
topology: tpu7x:2x2x1
jax: 0.10.0
libtpu: 0.0.40
codegen_flags: <defaults>
</compile_context>

<pallas_src>
import functools

import jax
import jax.numpy as jnp
from jax.experimental import pallas as pl
from jax.experimental.pallas import tpu as pltpu


HIDDEN = 20      # logical embedding size of GraphGIN
LANE = 128       # TPU lane width: pad feature / hidden / class dims to this
SUBLANE = 8      # pad the node axis to a multiple of this


def _round_up(x, m):
    return -(-x // m) * m


def _pad_to(a, shape):
    out = jnp.zeros(shape, a.dtype)
    return out.at[tuple(slice(0, s) for s in a.shape)].set(a)


# ---------------------------------------------------------------------------
# Fused kernel: 3 x (A@h -> Linear -> ReLU -> Linear -> ReLU -> L2-normalize)
#               -> masked global max/mean pool -> final Linear.
# All operands are whole-array VMEM blocks (everything fits comfortably at
# these sizes); A is loaded once and reused for all three layers.
# ---------------------------------------------------------------------------
def _fused_gin_kernel(a_ref, x_ref, w1_ref, b1_ref, w2_ref, b2_ref,
                      wpool_ref, blin_ref, o_ref, *, num_nodes):
    a = a_ref[...]                 # [Np, Np] aggregation matrix (loaded once)
    h = x_ref[...]                 # [Np, Dp] node features (zero-padded lanes)

    for li in range(3):            # unrolled at trace time, static indices
        # scatter-add aggregation == dense matmul with A[dst, src] = edge weight
        agg = jnp.dot(a, h, preferred_element_type=jnp.float32)
        h1 = jnp.maximum(
            jnp.dot(agg, w1_ref[li], preferred_element_type=jnp.float32)
            + b1_ref[li], 0.0)
        h2 = jnp.maximum(
            jnp.dot(h1, w2_ref[li], preferred_element_type=jnp.float32)
            + b2_ref[li], 0.0)
        # F.normalize(p=2, dim=1): x / max(||x||, 1e-12)
        #                       == x * rsqrt(max(||x||^2, 1e-24))
        sumsq = jnp.sum(h2 * h2, axis=1, keepdims=True)
        h = h2 * jax.lax.rsqrt(jnp.maximum(sumsq, 1e-24))
        # the reference's trailing ReLU is a no-op here: h2 >= 0 already

    # masked global max / mean pool over the true (unpadded) nodes.
    # h >= 0 everywhere, so zeroing the padded rows is a valid identity for
    # both the max and the sum (single mask instead of two).
    row = jax.lax.broadcasted_iota(jnp.int32, (h.shape[0], 1), 0)
    h_valid = jnp.where(row < num_nodes, h, 0.0)
    mx = jnp.max(h_valid, axis=0, keepdims=True)                   # [1, Dp]
    mn = jnp.sum(h_valid, axis=0, keepdims=True) * (1.0 / num_nodes)

    # concat([max, mean]) @ W_lin + b == max @ W_max + mean @ W_mean + b
    o_ref[...] = (jnp.dot(mx, wpool_ref[0], preferred_element_type=jnp.float32)
                  + jnp.dot(mn, wpool_ref[1], preferred_element_type=jnp.float32)
                  + blin_ref[...])


# ---------------------------------------------------------------------------
# Parameter construction (deterministic, torch.nn.Linear-style uniform init)
# ---------------------------------------------------------------------------
def init_linear(key, fan_in, fan_out):
    kw, kb = jax.random.split(key)
    bound = 1.0 / jnp.sqrt(float(fan_in))
    # stored already transposed for x @ W use: [fan_in, fan_out]
    w = jax.random.uniform(kw, (fan_in, fan_out), jnp.float32, -bound, bound)
    b = jax.random.uniform(kb, (1, fan_out), jnp.float32, -bound, bound)
    return w, b


def init_graph_gin_params(key, num_features, num_classes, hidden=HIDDEN):
    keys = jax.random.split(key, 7)
    params = {}
    dims_in = [num_features, hidden, hidden]
    for li in range(3):
        w1, b1 = init_linear(keys[2 * li], dims_in[li], hidden)
        w2, b2 = init_linear(keys[2 * li + 1], hidden, hidden)
        params[f"conv{li + 1}"] = (w1, b1, w2, b2)
    wl, bl = init_linear(keys[6], 2 * hidden, num_classes)
    params["lin"] = (wl, bl)
    return params


# ---------------------------------------------------------------------------
# Full forward: pad to lane-dense shapes, build the dense aggregation matrix,
# and run the single fused kernel.  (batch is implicitly all-zeros: 1 graph.)
# ---------------------------------------------------------------------------
def graph_gin_forward(params, x, edge_index, edge_weights=None):
    n, f = x.shape
    hidden = params["conv1"][0].shape[1]
    num_classes = params["lin"][0].shape[1]
    e = edge_index.shape[1]
    if edge_weights is None:
        edge_weights = jnp.ones((e,), jnp.float32)

    n_pad = _round_up(max(n, SUBLANE), SUBLANE)
    # one unified lane width for features / hidden so the per-layer weights can
    # be stacked into a single [3, D, D] operand
    d_pad = _round_up(max(f, hidden, LANE), LANE)
    c_pad = _round_up(max(num_classes, LANE), LANE)

    src, dst = edge_index[0], edge_index[1]
    # Dense aggregation matrix A[dst, src] += w  (GINConv_mask with explicit
    # edge_weight: no self loops, no (1+eps)*x_r term).
    # TODO(synk): for realistic graph sizes (N >~ a few thousand, esp. v7x's
    # 64 MiB VMEM) replace this XLA scatter + dense A@h with a tiled grid over
    # A (or a CSR scalar-prefetch gather kernel, O(E) instead of O(N^2)) and
    # stream A in bf16 with f32 accumulation; kept dense f32 here so the toy
    # forward matches the PyTorch reference exactly.
    adj = jnp.zeros((n_pad, n_pad), jnp.float32).at[dst, src].add(
        edge_weights.astype(jnp.float32))

    xp = _pad_to(x.astype(jnp.float32), (n_pad, d_pad))

    # Zero-pad and stack the per-layer parameters -> 8 lane-dense kernel inputs.
    w1s, b1s, w2s, b2s = [], [], [], []
    for li in range(3):
        w1, b1, w2, b2 = params[f"conv{li + 1}"]
        w1s.append(_pad_to(w1, (d_pad, d_pad)))
        b1s.append(_pad_to(b1, (1, d_pad)))
        w2s.append(_pad_to(w2, (d_pad, d_pad)))
        b2s.append(_pad_to(b2, (1, d_pad)))
    w1s, b1s = jnp.stack(w1s), jnp.stack(b1s)         # [3, D, D], [3, 1, D]
    w2s, b2s = jnp.stack(w2s), jnp.stack(b2s)

    w_lin, b_lin = params["lin"]
    # Split the [2H, C] Linear into max-pool / mean-pool halves in the wrapper
    # (avoids a sublane-unaligned in-kernel slice at H=20).
    wpool = jnp.stack([_pad_to(w_lin[:hidden, :], (d_pad, c_pad)),
                       _pad_to(w_lin[hidden:, :], (d_pad, c_pad))])  # [2, D, C]
    b_pad = _pad_to(b_lin, (1, c_pad))

    vmem = pl.BlockSpec(memory_space=pltpu.MemorySpace.VMEM)

    flops = (3 * (2 * n_pad * n_pad * d_pad + 4 * n_pad * d_pad * d_pad)
             + 4 * d_pad * c_pad)
    in_bytes = 4 * (n_pad * n_pad + n_pad * d_pad
                    + 3 * (2 * d_pad * d_pad + 2 * d_pad)
                    + 2 * d_pad * c_pad + c_pad)
    cost = pl.CostEstimate(flops=flops, transcendentals=3 * n_pad,
                           bytes_accessed=in_bytes + 4 * c_pad)

    # whole-array blocks (no grid) + live intermediates (agg/h1/h2/h), with slack
    scratch_bytes = 4 * 4 * n_pad * d_pad
    vmem_limit = min(100 * 1024 * 1024,
                     max(32 * 1024 * 1024, int(1.5 * (in_bytes + scratch_bytes))))

    kernel = functools.partial(_fused_gin_kernel, num_nodes=n)

    logits = pl.pallas_call(
        kernel,
        out_shape=jax.ShapeDtypeStruct((1, c_pad), jnp.float32),
        in_specs=[vmem] * 8,
        out_specs=vmem,
        compiler_params=pltpu.CompilerParams(vmem_limit_bytes=vmem_limit),
        cost_estimate=cost,
    )(adj, xp, w1s, b1s, w2s, b2s, wpool, b_pad)

    return logits[:, :num_classes]


if __name__ == "__main__":
    num_features = 10
    num_classes = 2
    N = 16          # nodes
    E = 40          # edges

    key = jax.random.PRNGKey(0)
    k_x, k_e, k_p = jax.random.split(key, 3)

    x = jax.random.normal(k_x, (N, num_features), jnp.float32)
    edge_index = jax.random.randint(k_e, (2, E), 0, N, dtype=jnp.int32)
    edge_weights = jnp.ones((E,), jnp.float32)

    params = init_graph_gin_params(k_p, num_features, num_classes)

    out = jax.jit(graph_gin_forward)(params, x, edge_index, edge_weights)
    jax.block_until_ready(out)
    assert out.shape == (1, num_classes)
    print("KERNEL_OK")
</pallas_src>

<mosaic_0001>
module attributes {stable_mosaic.version = 11 : i64} {
  func.func @_fused_gin_kernel(%arg0: memref<16x16xf32, #tpu.memory_space<vmem>>, %arg1: memref<16x128xf32, #tpu.memory_space<vmem>>, %arg2: memref<3x128x128xf32, #tpu.memory_space<vmem>>, %arg3: memref<3x1x128xf32, #tpu.memory_space<vmem>>, %arg4: memref<3x128x128xf32, #tpu.memory_space<vmem>>, %arg5: memref<3x1x128xf32, #tpu.memory_space<vmem>>, %arg6: memref<2x128x128xf32, #tpu.memory_space<vmem>>, %arg7: memref<1x128xf32, #tpu.memory_space<vmem>>, %arg8: memref<1x128xf32, #tpu.memory_space<vmem>>) attributes {dimension_semantics = [], scalar_prefetch = 0 : i64, scratch_operands = 0 : i64, tpu.core_type = #tpu.core_type<tc>} {
    %c0 = arith.constant 0 : index
    %c0_0 = arith.constant 0 : index
    %0 = vector.load %arg0[%c0, %c0_0] : memref<16x16xf32, #tpu.memory_space<vmem>>, vector<16x16xf32>
    %c0_1 = arith.constant 0 : index
    %c0_2 = arith.constant 0 : index
    %1 = vector.load %arg1[%c0_1, %c0_2] : memref<16x128xf32, #tpu.memory_space<vmem>>, vector<16x128xf32>
    %cst = arith.constant dense<0.000000e+00> : vector<16x128xf32>
    %2 = tpu.matmul %0, %1, %cst {dimension_numbers = #tpu.dot_dimension_numbers<[1], [0], [0], [1], [0, 0, 1, 1], [], []>} : vector<16x16xf32>, vector<16x128xf32>, vector<16x128xf32> -> vector<16x128xf32>
    %c0_3 = arith.constant 0 : index
    %c0_4 = arith.constant 0 : index
    %c0_5 = arith.constant 0 : index
    %3 = vector.load %arg2[%c0_3, %c0_4, %c0_5] : memref<3x128x128xf32, #tpu.memory_space<vmem>>, vector<1x128x128xf32>
    %4 = vector.shape_cast %3 : vector<1x128x128xf32> to vector<128x128xf32>
    %cst_6 = arith.constant dense<0.000000e+00> : vector<16x128xf32>
    %5 = tpu.matmul %2, %4, %cst_6 {dimension_numbers = #tpu.dot_dimension_numbers<[1], [0], [0], [1], [0, 0, 1, 1], [], []>} : vector<16x128xf32>, vector<128x128xf32>, vector<16x128xf32> -> vector<16x128xf32>
    %c0_7 = arith.constant 0 : index
    %c0_8 = arith.constant 0 : index
    %c0_9 = arith.constant 0 : index
    %6 = vector.load %arg3[%c0_7, %c0_8, %c0_9] : memref<3x1x128xf32, #tpu.memory_space<vmem>>, vector<1x1x128xf32>
    %7 = vector.shape_cast %6 : vector<1x1x128xf32> to vector<1x128xf32>
    %8 = vector.broadcast %7 : vector<1x128xf32> to vector<16x128xf32>
    %9 = arith.addf %5, %8 : vector<16x128xf32>
    %cst_10 = arith.constant 0.000000e+00 : f32
    %10 = vector.broadcast %cst_10 : f32 to vector<16x128xf32>
    %11 = arith.maximumf %9, %10 : vector<16x128xf32>
    %c0_11 = arith.constant 0 : index
    %c0_12 = arith.constant 0 : index
    %c0_13 = arith.constant 0 : index
    %12 = vector.load %arg4[%c0_11, %c0_12, %c0_13] : memref<3x128x128xf32, #tpu.memory_space<vmem>>, vector<1x128x128xf32>
    %13 = vector.shape_cast %12 : vector<1x128x128xf32> to vector<128x128xf32>
    %cst_14 = arith.constant dense<0.000000e+00> : vector<16x128xf32>
    %14 = tpu.matmul %11, %13, %cst_14 {dimension_numbers = #tpu.dot_dimension_numbers<[1], [0], [0], [1], [0, 0, 1, 1], [], []>} : vector<16x128xf32>, vector<128x128xf32>, vector<16x128xf32> -> vector<16x128xf32>
    %c0_15 = arith.constant 0 : index
    %c0_16 = arith.constant 0 : index
    %c0_17 = arith.constant 0 : index
    %15 = vector.load %arg5[%c0_15, %c0_16, %c0_17] : memref<3x1x128xf32, #tpu.memory_space<vmem>>, vector<1x1x128xf32>
    %16 = vector.shape_cast %15 : vector<1x1x128xf32> to vector<1x128xf32>
    %17 = vector.broadcast %16 : vector<1x128xf32> to vector<16x128xf32>
    %18 = arith.addf %14, %17 : vector<16x128xf32>
    %cst_18 = arith.constant 0.000000e+00 : f32
    %19 = vector.broadcast %cst_18 : f32 to vector<16x128xf32>
    %20 = arith.maximumf %18, %19 : vector<16x128xf32>
    %21 = arith.mulf %20, %20 : vector<16x128xf32>
    %cst_19 = arith.constant dense<0.000000e+00> : vector<16xf32>
    %22 = vector.multi_reduction <add>, %21, %cst_19 [1] : vector<16x128xf32> to vector<16xf32>
    %23 = vector.shape_cast %22 : vector<16xf32> to vector<16x1xf32>
    %cst_20 = arith.constant 1.000000e-24 : f32
    %24 = vector.broadcast %cst_20 : f32 to vector<16x1xf32>
    %25 = arith.maximumf %23, %24 : vector<16x1xf32>
    %26 = math.rsqrt %25 : vector<16x1xf32>
    %27 = vector.broadcast %26 : vector<16x1xf32> to vector<16x128xf32>
    %28 = arith.mulf %20, %27 : vector<16x128xf32>
    %cst_21 = arith.constant dense<0.000000e+00> : vector<16x128xf32>
    %29 = tpu.matmul %0, %28, %cst_21 {dimension_numbers = #tpu.dot_dimension_numbers<[1], [0], [0], [1], [0, 0, 1, 1], [], []>} : vector<16x16xf32>, vector<16x128xf32>, vector<16x128xf32> -> vector<16x128xf32>
    %c1 = arith.constant 1 : index
    %c0_22 = arith.constant 0 : index
    %c0_23 = arith.constant 0 : index
    %30 = vector.load %arg2[%c1, %c0_22, %c0_23] : memref<3x128x128xf32, #tpu.memory_space<vmem>>, vector<1x128x128xf32>
    %31 = vector.shape_cast %30 : vector<1x128x128xf32> to vector<128x128xf32>
    %cst_24 = arith.constant dense<0.000000e+00> : vector<16x128xf32>
    %32 = tpu.matmul %29, %31, %cst_24 {dimension_numbers = #tpu.dot_dimension_numbers<[1], [0], [0], [1], [0, 0, 1, 1], [], []>} : vector<16x128xf32>, vector<128x128xf32>, vector<16x128xf32> -> vector<16x128xf32>
    %c1_25 = arith.constant 1 : index
    %c0_26 = arith.constant 0 : index
    %c0_27 = arith.constant 0 : index
    %33 = vector.load %arg3[%c1_25, %c0_26, %c0_27] : memref<3x1x128xf32, #tpu.memory_space<vmem>>, vector<1x1x128xf32>
    %34 = vector.shape_cast %33 : vector<1x1x128xf32> to vector<1x128xf32>
    %35 = vector.broadcast %34 : vector<1x128xf32> to vector<16x128xf32>
    %36 = arith.addf %32, %35 : vector<16x128xf32>
    %cst_28 = arith.constant 0.000000e+00 : f32
    %37 = vector.broadcast %cst_28 : f32 to vector<16x128xf32>
    %38 = arith.maximumf %36, %37 : vector<16x128xf32>
    %c1_29 = arith.constant 1 : index
    %c0_30 = arith.constant 0 : index
    %c0_31 = arith.constant 0 : index
    %39 = vector.load %arg4[%c1_29, %c0_30, %c0_31] : memref<3x128x128xf32, #tpu.memory_space<vmem>>, vector<1x128x128xf32>
    %40 = vector.shape_cast %39 : vector<1x128x128xf32> to vector<128x128xf32>
    %cst_32 = arith.constant dense<0.000000e+00> : vector<16x128xf32>
    %41 = tpu.matmul %38, %40, %cst_32 {dimension_numbers = #tpu.dot_dimension_numbers<[1], [0], [0], [1], [0, 0, 1, 1], [], []>} : vector<16x128xf32>, vector<128x128xf32>, vector<16x128xf32> -> vector<16x128xf32>
    %c1_33 = arith.constant 1 : index
    %c0_34 = arith.constant 0 : index
    %c0_35 = arith.constant 0 : index
    %42 = vector.load %arg5[%c1_33, %c0_34, %c0_35] : memref<3x1x128xf32, #tpu.memory_space<vmem>>, vector<1x1x128xf32>
    %43 = vector.shape_cast %42 : vector<1x1x128xf32> to vector<1x128xf32>
    %44 = vector.broadcast %43 : vector<1x128xf32> to vector<16x128xf32>
    %45 = arith.addf %41, %44 : vector<16x128xf32>
    %cst_36 = arith.constant 0.000000e+00 : f32
    %46 = vector.broadcast %cst_36 : f32 to vector<16x128xf32>
    %47 = arith.maximumf %45, %46 : vector<16x128xf32>
    %48 = arith.mulf %47, %47 : vector<16x128xf32>
    %cst_37 = arith.constant dense<0.000000e+00> : vector<16xf32>
    %49 = vector.multi_reduction <add>, %48, %cst_37 [1] : vector<16x128xf32> to vector<16xf32>
    %50 = vector.shape_cast %49 : vector<16xf32> to vector<16x1xf32>
    %cst_38 = arith.constant 1.000000e-24 : f32
    %51 = vector.broadcast %cst_38 : f32 to vector<16x1xf32>
    %52 = arith.maximumf %50, %51 : vector<16x1xf32>
    %53 = math.rsqrt %52 : vector<16x1xf32>
    %54 = vector.broadcast %53 : vector<16x1xf32> to vector<16x128xf32>
    %55 = arith.mulf %47, %54 : vector<16x128xf32>
    %cst_39 = arith.constant dense<0.000000e+00> : vector<16x128xf32>
    %56 = tpu.matmul %0, %55, %cst_39 {dimension_numbers = #tpu.dot_dimension_numbers<[1], [0], [0], [1], [0, 0, 1, 1], [], []>} : vector<16x16xf32>, vector<16x128xf32>, vector<16x128xf32> -> vector<16x128xf32>
    %c2 = arith.constant 2 : index
    %c0_40 = arith.constant 0 : index
    %c0_41 = arith.constant 0 : index
    %57 = vector.load %arg2[%c2, %c0_40, %c0_41] : memref<3x128x128xf32, #tpu.memory_space<vmem>>, vector<1x128x128xf32>
    %58 = vector.shape_cast %57 : vector<1x128x128xf32> to vector<128x128xf32>
    %cst_42 = arith.constant dense<0.000000e+00> : vector<16x128xf32>
    %59 = tpu.matmul %56, %58, %cst_42 {dimension_numbers = #tpu.dot_dimension_numbers<[1], [0], [0], [1], [0, 0, 1, 1], [], []>} : vector<16x128xf32>, vector<128x128xf32>, vector<16x128xf32> -> vector<16x128xf32>
    %c2_43 = arith.constant 2 : index
    %c0_44 = arith.constant 0 : index
    %c0_45 = arith.constant 0 : index
    %60 = vector.load %arg3[%c2_43, %c0_44, %c0_45] : memref<3x1x128xf32, #tpu.memory_space<vmem>>, vector<1x1x128xf32>
    %61 = vector.shape_cast %60 : vector<1x1x128xf32> to vector<1x128xf32>
    %62 = vector.broadcast %61 : vector<1x128xf32> to vector<16x128xf32>
    %63 = arith.addf %59, %62 : vector<16x128xf32>
    %cst_46 = arith.constant 0.000000e+00 : f32
    %64 = vector.broadcast %cst_46 : f32 to vector<16x128xf32>
    %65 = arith.maximumf %63, %64 : vector<16x128xf32>
    %c2_47 = arith.constant 2 : index
    %c0_48 = arith.constant 0 : index
    %c0_49 = arith.constant 0 : index
    %66 = vector.load %arg4[%c2_47, %c0_48, %c0_49] : memref<3x128x128xf32, #tpu.memory_space<vmem>>, vector<1x128x128xf32>
    %67 = vector.shape_cast %66 : vector<1x128x128xf32> to vector<128x128xf32>
    %cst_50 = arith.constant dense<0.000000e+00> : vector<16x128xf32>
    %68 = tpu.matmul %65, %67, %cst_50 {dimension_numbers = #tpu.dot_dimension_numbers<[1], [0], [0], [1], [0, 0, 1, 1], [], []>} : vector<16x128xf32>, vector<128x128xf32>, vector<16x128xf32> -> vector<16x128xf32>
    %c2_51 = arith.constant 2 : index
    %c0_52 = arith.constant 0 : index
    %c0_53 = arith.constant 0 : index
    %69 = vector.load %arg5[%c2_51, %c0_52, %c0_53] : memref<3x1x128xf32, #tpu.memory_space<vmem>>, vector<1x1x128xf32>
    %70 = vector.shape_cast %69 : vector<1x1x128xf32> to vector<1x128xf32>
    %71 = vector.broadcast %70 : vector<1x128xf32> to vector<16x128xf32>
    %72 = arith.addf %68, %71 : vector<16x128xf32>
    %cst_54 = arith.constant 0.000000e+00 : f32
    %73 = vector.broadcast %cst_54 : f32 to vector<16x128xf32>
    %74 = arith.maximumf %72, %73 : vector<16x128xf32>
    %75 = arith.mulf %74, %74 : vector<16x128xf32>
    %cst_55 = arith.constant dense<0.000000e+00> : vector<16xf32>
    %76 = vector.multi_reduction <add>, %75, %cst_55 [1] : vector<16x128xf32> to vector<16xf32>
    %77 = vector.shape_cast %76 : vector<16xf32> to vector<16x1xf32>
    %cst_56 = arith.constant 1.000000e-24 : f32
    %78 = vector.broadcast %cst_56 : f32 to vector<16x1xf32>
    %79 = arith.maximumf %77, %78 : vector<16x1xf32>
    %80 = math.rsqrt %79 : vector<16x1xf32>
    %81 = vector.broadcast %80 : vector<16x1xf32> to vector<16x128xf32>
    %82 = arith.mulf %74, %81 : vector<16x128xf32>
    %83 = tpu.iota {dimensions = array<i32: 0>} : vector<16x1xi32>
    %c16_i32 = arith.constant 16 : i32
    %84 = vector.broadcast %c16_i32 : i32 to vector<16x1xi32>
    %85 = arith.cmpi slt, %83, %84 : vector<16x1xi32>
    %cst_57 = arith.constant 0.000000e+00 : f32
    %86 = vector.shape_cast %85 : vector<16x1xi1> to vector<16x1xi1>
    %87 = vector.broadcast %86 : vector<16x1xi1> to vector<16x128xi1>
    %88 = vector.broadcast %cst_57 : f32 to vector<16x128xf32>
    %89 = arith.select %87, %82, %88 : vector<16x128xi1>, vector<16x128xf32>
    %cst_58 = arith.constant dense<0xFF800000> : vector<128xf32>
    %90 = vector.multi_reduction <maximumf>, %89, %cst_58 [0] : vector<16x128xf32> to vector<128xf32>
    %91 = vector.shape_cast %90 : vector<128xf32> to vector<1x128xf32>
    %cst_59 = arith.constant dense<0.000000e+00> : vector<128xf32>
    %92 = vector.multi_reduction <add>, %89, %cst_59 [0] : vector<16x128xf32> to vector<128xf32>
    %93 = vector.shape_cast %92 : vector<128xf32> to vector<1x128xf32>
    %cst_60 = arith.constant 6.250000e-02 : f32
    %94 = vector.broadcast %cst_60 : f32 to vector<1x128xf32>
    %95 = arith.mulf %93, %94 : vector<1x128xf32>
    %c0_61 = arith.constant 0 : index
    %c0_62 = arith.constant 0 : index
    %c0_63 = arith.constant 0 : index
    %96 = vector.load %arg6[%c0_61, %c0_62, %c0_63] : memref<2x128x128xf32, #tpu.memory_space<vmem>>, vector<1x128x128xf32>
    %97 = vector.shape_cast %96 : vector<1x128x128xf32> to vector<128x128xf32>
    %cst_64 = arith.constant dense<0.000000e+00> : vector<1x128xf32>
    %98 = tpu.matmul %91, %97, %cst_64 {dimension_numbers = #tpu.dot_dimension_numbers<[1], [0], [0], [1], [0, 0, 1, 1], [], []>} : vector<1x128xf32>, vector<128x128xf32>, vector<1x128xf32> -> vector<1x128xf32>
    %c1_65 = arith.constant 1 : index
    %c0_66 = arith.constant 0 : index
    %c0_67 = arith.constant 0 : index
    %99 = vector.load %arg6[%c1_65, %c0_66, %c0_67] : memref<2x128x128xf32, #tpu.memory_space<vmem>>, vector<1x128x128xf32>
    %100 = vector.shape_cast %99 : vector<1x128x128xf32> to vector<128x128xf32>
    %cst_68 = arith.constant dense<0.000000e+00> : vector<1x128xf32>
    %101 = tpu.matmul %95, %100, %cst_68 {dimension_numbers = #tpu.dot_dimension_numbers<[1], [0], [0], [1], [0, 0, 1, 1], [], []>} : vector<1x128xf32>, vector<128x128xf32>, vector<1x128xf32> -> vector<1x128xf32>
    %102 = arith.addf %98, %101 : vector<1x128xf32>
    %c0_69 = arith.constant 0 : index
    %c0_70 = arith.constant 0 : index
    %103 = vector.load %arg7[%c0_69, %c0_70] : memref<1x128xf32, #tpu.memory_space<vmem>>, vector<1x128xf32>
    %104 = arith.addf %102, %103 : vector<1x128xf32>
    %c0_71 = arith.constant 0 : index
    %c0_72 = arith.constant 0 : index
    %105 = vector.load %arg8[%c0_71, %c0_72] : memref<1x128xf32, #tpu.memory_space<vmem>>, vector<1x128xf32>
    tpu.vector_store %arg8[%c0_71, %c0_72], %104 {strides = array<i32>} : memref<1x128xf32, #tpu.memory_space<vmem>>, vector<1x128xf32>,
    return
  }
}

</mosaic_0001>

<bundles_post_ra>
// kernel: graph_gin_forward.1
= control target key start
LH: loop header
LB: loop body
LE: loop exit
PB: predicated region body
PF: predicated region fallthrough
CT: control target
= control target key end

     0   :  { %vm34_vm0 = vcmask 130048   ;;  %s2489_s0 = inlined_call_operand.vmem [shape: f32[16,16], index: 0, kind: input, shape index: {}]   ;;  %s2490_s1 = inlined_call_operand.vmem [shape: f32[16,128], index: 1, kind: input, shape index: {}]   ;;  %s2491_s2 = inlined_call_operand.vmem [shape: f32[3,128,128], index: 2, kind: input, shape index: {}]   ;;  %s2492_s3 = inlined_call_operand.vmem [shape: f32[3,1,128], index: 3, kind: input, shape index: {}]   ;;  %s2493_s4 = inlined_call_operand.vmem [shape: f32[3,128,128], index: 4, kind: input, shape index: {}]   ;;  %s2494_s5 = inlined_call_operand.vmem [shape: f32[3,1,128], index: 5, kind: input, shape index: {}]   ;;  %s2495_s6 = inlined_call_operand.vmem [shape: f32[2,128,128], index: 6, kind: input, shape index: {}]   ;;  %s2496_s7 = inlined_call_operand.vmem [shape: f32[1,128], index: 7, kind: input, shape index: {}]   ;;  %s2497_s8 = inlined_call_operand.hbm [shape: f32[1,128], index: 8, kind: output, shape index: {}]  }
   0x1   :  { %v32_v0 = vld [vmem:[%s2490_s1] sm:$0xff]  ;;  %v33_v1 = vld [vmem:[%s2490_s1 + $0x8] sm:$0xff]  ;;  %v118_v7 = vld [vmem:[%s2491_s2 + $0x10] sm:$0xff] }
   0x2   :  { %v2027_v2 = vld [vmem:[%s2489_s0] sm:$0xff]  ;;  %v1677_v3 = vpack.c.bf16 %v33_v1, %v32_v0  ;;  %v117_v5 = vld [vmem:[%s2491_s2 + $0x8] sm:$0xff]  ;;  %v119_v8 = vld [vmem:[%s2491_s2 + $0x18] sm:$0xff] }
   0x3   :  { %1380 = vmatprep.mubr.msk.f32.mxu0 %vm34_vm0, %v2027_v2  ;;  %v116_v4 = vld [vmem:[%s2491_s2] sm:$0xff]  ;;  %v1685_v9 = vpack.c.bf16 %v119_v8, %v118_v7  ;;  %v121_v11 = vld [vmem:[%s2491_s2 + $0x28] sm:$0xff] }
   0x4   :  { %v1681_v6 = vpack.c.bf16 %v117_v5, %v116_v4  ;;  %1678 = vmatprep.subr.bf16.mxu0 %v1677_v3  ;;  %v120_v10 = vld [vmem:[%s2491_s2 + $0x20] sm:$0xff]  ;;  %v2052_v12 = vld [vmem:[%s2489_s0 + $0x8] sm:$0xff] }
   0x5   :  { %1680 = vmatpush3.bf16.msra.mxu0 %v1677_v3  ;;  %v1689_v13 = vpack.c.bf16 %v121_v11, %v120_v10 }
   0x6   :  { %1682 = vmatprep.subr.bf16.mxu1 %v1681_v6 }
   0x7   :  { %1684 = vmatpush3.bf16.msra.mxu1 %v1681_v6 }
   0x8   :  { %1686 = vmatprep.subr.bf16.mxu1 %v1685_v9 }
   0x9   :  { %13 = vsyncpa [#allocation3], 0  ;;  %1381 = vmatmul.mubr.msk.f32.vlgmr.msra.gmra.mrb[0].mxu0 %vm34_vm0, %v2052_v12  ;;  %v122_v14 = vld [vmem:[%s2491_s2 + $0x30] sm:$0xff]  ;;  %v123_v15 = vld [vmem:[%s2491_s2 + $0x38] sm:$0xff]  ;;  %vm1970_vm1 = vmmov 0   ;;  %s1972_s0 = smov [#allocation2]  }
   0xa   :  { %v1693_v16 = vpack.c.bf16 %v123_v15, %v122_v14  ;;  %v124_v17 = vld [vmem:[%s2491_s2 + $0x40] sm:$0xff]  ;;  %v125_v18 = vld [vmem:[%s2491_s2 + $0x48] sm:$0xff]  ;;  %v126_v20 = vld [vmem:[%s2491_s2 + $0x50] sm:$0xff]  ;;  %s1118_s28 = sshll.u32 %s1972_s0, 4  ;;  %s1119_s28 = int_to_ptr.vmem [resolvable:$true] %s1118_s28 }
   0xb   :  { %1688 = vmatpush3.bf16.msra.mxu1 %v1685_v9  ;;  %v1697_v19 = vpack.c.bf16 %v125_v18, %v124_v17  ;;  %v127_v21 = vld [vmem:[%s2491_s2 + $0x58] sm:$0xff]  ;;  %v128_v23 = vld [vmem:[%s2491_s2 + $0x60] sm:$0xff]  ;;  %v129_v24 = vld [vmem:[%s2491_s2 + $0x68] sm:$0xff]  ;;  %s1945_s29 = scalar_lea.vmem %s1119_s28, 16  ;;  %s1949_s30 = scalar_lea.vmem %s1119_s28, 32 }
   0xc   :  { %1690 = vmatprep.subr.bf16.mxu1 %v1689_v13  ;;  %v1701_v22 = vpack.c.bf16 %v127_v21, %v126_v20  ;;  %v1705_v25 = vpack.c.bf16 %v129_v24, %v128_v23  ;;  %v130_v26 = vld [vmem:[%s2491_s2 + $0x70] sm:$0xff]  ;;  %v131_v27 = vld [vmem:[%s2491_s2 + $0x78] sm:$0xff]  ;;  %v216_v29 = vld [vmem:[%s2493_s4] sm:$0xff]  ;;  %p1946_p0 = scmp.ne.s32.totalorder %s1119_s28, %s1945_s29  ;;  %p1950_p1 = scmp.lt.s32.totalorder %s1119_s28, %s1119_s28 }
   0xd   :  { %v1709_v28 = vpack.c.bf16 %v131_v27, %v130_v26  ;;  %v217_v30 = vld [vmem:[%s2493_s4 + $0x8] sm:$0xff]  ;;  %v218_v31 = vld [vmem:[%s2493_s4 + $0x10] sm:$0xff]  ;;  %v219_v33 = vld [vmem:[%s2493_s4 + $0x18] sm:$0xff]  ;;  %p1951_p2 = scmp.lt.s32.totalorder %s1949_s30, %s1945_s29 }
   0xe   :  { %v1713_v32 = vpack.c.bf16 %v217_v30, %v216_v29  ;;  %v1717_v34 = vpack.c.bf16 %v219_v33, %v218_v31  ;;  %v220_v35 = vld [vmem:[%s2493_s4 + $0x20] sm:$0xff]  ;;  %v221_v36 = vld [vmem:[%s2493_s4 + $0x28] sm:$0xff]  ;;  %v222_v38 = vld [vmem:[%s2493_s4 + $0x30] sm:$0xff] }
   0xf   :  { %1692 = vmatpush3.bf16.msra.mxu1 %v1689_v13  ;;  %v1721_v37 = vpack.c.bf16 %v221_v36, %v220_v35  ;;  %v223_v39 = vld [vmem:[%s2493_s4 + $0x38] sm:$0xff]  ;;  %v224_v41 = vld [vmem:[%s2493_s4 + $0x40] sm:$0xff]  ;;  %v225_v42 = vld [vmem:[%s2493_s4 + $0x48] sm:$0xff]  ;;  %p1952_p3 = por %p1951_p2, %p1950_p1 }
  0x10   :  { %1694 = vmatprep.subr.bf16.mxu1 %v1693_v16  ;;  %1714 = vmatprep.subr.bf16.mxu0 %v1713_v32  ;;  %v1725_v40 = vpack.c.bf16 %v223_v39, %v222_v38  ;;  %v1729_v43 = vpack.c.bf16 %v225_v42, %v224_v41  ;;  %v226_v44 = vld [vmem:[%s2493_s4 + $0x50] sm:$0xff]  ;;  %v227_v45 = vld [vmem:[%s2493_s4 + $0x58] sm:$0xff]  ;;  %v228_v47 = vld [vmem:[%s2493_s4 + $0x60] sm:$0xff] }
  0x11   :  { %1716 = vmatpush3.bf16.msra.mxu0 %v1713_v32  ;;  %v1733_v46 = vpack.c.bf16 %v227_v45, %v226_v44  ;;  %v229_v48 = vld [vmem:[%s2493_s4 + $0x68] sm:$0xff]  ;;  %v230_v52 = vld [vmem:[%s2493_s4 + $0x70] sm:$0xff]  ;;  %v231_v53 = vld [vmem:[%s2493_s4 + $0x78] sm:$0xff]  ;;  %p1953_p4 = pnand %p1952_p3, %p1946_p0 }
  0x12   :  { %1718 = vmatprep.subr.bf16.mxu0 %v1717_v34  ;;  %v1737_v49 = vpack.c.bf16 %v229_v48, %v228_v47  ;;  %v1741_v54 = vpack.c.bf16 %v231_v53, %v230_v52  ;;  %v1128_v55 = vld [vmem:[%s2492_s3] ss:$0 sm:$0xff]  ;;  %v1133_v9 = vld [vmem:[%s2491_s2 + $0x88] sm:$0xff]  ;;  %v1134_v10 = vld [vmem:[%s2491_s2 + $0x90] sm:$0xff] }
  0x13   :  { %1696 = vmatpush3.bf16.msra.mxu1 %v1693_v16  ;;  %v1129_v62 = vld [vmem:[%s2494_s5] ss:$0 sm:$0xff]  ;;  %v1135_v13 = vld [vmem:[%s2491_s2 + $0x98] sm:$0xff]  ;;  %v1137_v16 = vld [vmem:[%s2491_s2 + $0xa8] sm:$0xff] }
  0x14   :  { %1698 = vmatprep.subr.bf16.mxu1 %v1697_v19  ;;  %v1132_v8 = vld [vmem:[%s2491_s2 + $0x80] sm:$0xff]  ;;  %v1753_v14 = vpack.c.bf16 %v1135_v13, %v1134_v10  ;;  %v1138_v18 = vld [vmem:[%s2491_s2 + $0xb0] sm:$0xff]  ;;  %v1147_v31 = vld [vmem:[%s2491_s2 + $0xf8] sm:$0xff] }
  0x15   :  { %1720 = vmatpush3.bf16.msra.mxu0 %v1717_v34  ;;  %v1749_v11 = vpack.c.bf16 %v1133_v9, %v1132_v8  ;;  %v1136_v15 = vld [vmem:[%s2491_s2 + $0xa0] sm:$0xff]  ;;  %v1142_v24 = vld [vmem:[%s2491_s2 + $0xd0] sm:$0xff]  ;;  %v1157_v52 = vld [vmem:[%s2493_s4 + $0xb8] sm:$0xff] }
  0x16   :  { %1722 = vmatprep.subr.bf16.mxu0 %v1721_v37  ;;  %v1757_v17 = vpack.c.bf16 %v1137_v16, %v1136_v15  ;;  %v1140_v21 = vld [vmem:[%s2491_s2 + $0xc0] sm:$0xff]  ;;  %v1146_v30 = vld [vmem:[%s2491_s2 + $0xf0] sm:$0xff] }
  0x17   :  { %1700 = vmatpush3.bf16.msra.mxu1 %v1697_v19  ;;  %v1139_v19 = vld [vmem:[%s2491_s2 + $0xb8] sm:$0xff]  ;;  %v1144_v27 = vld [vmem:[%s2491_s2 + $0xe0] sm:$0xff]  ;;  %v1777_v32 = vpack.c.bf16 %v1147_v31, %v1146_v30  ;;  %v1152_v44 = vld [vmem:[%s2493_s4 + $0x90] sm:$0xff] }
  0x18   :  { %1702 = vmatprep.subr.bf16.mxu1 %v1701_v22  ;;  %v1761_v20 = vpack.c.bf16 %v1139_v19, %v1138_v18  ;;  %v1150_v42 = vld [vmem:[%s2493_s4 + $0x80] sm:$0xff]  ;;  %v1176_v30 = vld [vmem:[%s2491_s2 + $0x130] sm:$0xff]  ;;  %v1177_v31 = vld [vmem:[%s2491_s2 + $0x138] sm:$0xff] }
  0x19   :  { %1724 = vmatpush3.bf16.msra.mxu0 %v1721_v37  ;;  %v1154_v48 = vld [vmem:[%s2493_s4 + $0xa0] sm:$0xff] }
  0x1a   :  { %1726 = vmatprep.subr.bf16.mxu0 %v1725_v40 }
  0x1b   :  { %1704 = vmatpush3.bf16.msra.mxu1 %v1701_v22  ;;  %v1141_v22 = vld [vmem:[%s2491_s2 + $0xc8] sm:$0xff] }
  0x1c   :  { %1706 = vmatprep.subr.bf16.mxu1 %v1705_v25  ;;  %v1765_v23 = vpack.c.bf16 %v1141_v22, %v1140_v21  ;;  %v1170_v21 = vld [vmem:[%s2491_s2 + $0x100] sm:$0xff]  ;;  %v1171_v22 = vld [vmem:[%s2491_s2 + $0x108] sm:$0xff] }
  0x1d   :  { %1728 = vmatpush3.bf16.msra.mxu0 %v1725_v40 }
  0x1e   :  { %1730 = vmatprep.subr.bf16.mxu0 %v1729_v43 }
  0x1f   :  { %1708 = vmatpush3.bf16.msra.mxu1 %v1705_v25  ;;  %v1143_v25 = vld [vmem:[%s2491_s2 + $0xd8] sm:$0xff] }
  0x20   :  { %1710 = vmatprep.subr.bf16.mxu1 %v1709_v28  ;;  %v1769_v26 = vpack.c.bf16 %v1143_v25, %v1142_v24  ;;  %v1817_v24 = vpack.c.bf16 %v1171_v22, %v1170_v21  ;;  %v1173_v25 = vld [vmem:[%s2491_s2 + $0x118] sm:$0xff] }
  0x21   :  { %1732 = vmatpush3.bf16.msra.mxu0 %v1729_v43  ;;  %v1151_v43 = vld [vmem:[%s2493_s4 + $0x88] sm:$0xff] }
  0x22   :  { %1734 = vmatprep.subr.bf16.mxu0 %v1733_v46  ;;  %v1781_v45 = vpack.c.bf16 %v1151_v43, %v1150_v42  ;;  %v1184_v42 = vld [vmem:[%s2491_s2 + $0x170] sm:$0xff]  ;;  %v1185_v43 = vld [vmem:[%s2491_s2 + $0x178] sm:$0xff] }
  0x23   :  { %1712 = vmatpush3.bf16.msra.mxu1 %v1709_v28  ;;  %v1145_v28 = vld [vmem:[%s2491_s2 + $0xe8] sm:$0xff] }
  0x24   :  { %v1773_v29 = vpack.c.bf16 %v1145_v28, %v1144_v27  ;;  %v1174_v27 = vld [vmem:[%s2491_s2 + $0x120] sm:$0xff]  ;;  %v1175_v28 = vld [vmem:[%s2491_s2 + $0x128] sm:$0xff] }
  0x25   :  { %1736 = vmatpush3.bf16.msra.mxu0 %v1733_v46  ;;  %v1153_v46 = vld [vmem:[%s2493_s4 + $0x98] sm:$0xff] }
  0x26   :  { %1738 = vmatprep.subr.bf16.mxu0 %v1737_v49  ;;  %v1785_v47 = vpack.c.bf16 %v1153_v46, %v1152_v44  ;;  %v1845_v44 = vpack.c.bf16 %v1185_v43, %v1184_v42  ;;  %v1208_v42 = vld [vmem:[%s2495_s6 + $0x90] sm:$0xff]  ;;  %v1209_v43 = vld [vmem:[%s2495_s6 + $0x98] sm:$0xff] }
  0x29   :  { %1740 = vmatpush3.bf16.msra.mxu0 %v1737_v49  ;;  %v1155_v49 = vld [vmem:[%s2493_s4 + $0xa8] sm:$0xff] }
  0x2a   :  { %1742 = vmatprep.subr.bf16.mxu0 %v1741_v54 }
  0x2d   :  { %1744 = vmatpush3.bf16.msra.mxu0 %v1741_v54  ;;  %v1158_v54 = vld [vmem:[%s2493_s4 + $0xc0] sm:$0xff] }
  0x2e   :  { %1750 = vmatprep.subr.bf16.mxu0 %v1749_v11 }
  0xdc   :  { %v1382_v50 = vpop.f32.mrb[0].mxu0 }
  0xdd   :  { %v107_v51 = vpop.f32.mrb[1].mxu0 }
  0xde   :  { %1415 = vmatprep.mubr.f32.mxu1 %v107_v51  ;;  %v1156_v51 = vld [vmem:[%s2493_s4 + $0xb0] sm:$0xff] }
  0xdf   :  { %1416 = vmatmul.mubr.f32.vlgmr.msra.gmra.mrb[0].mxu1 %v1382_v50  ;;  %v1789_v50 = vpack.c.bf16 %v1155_v49, %v1154_v48  ;;  %v1793_v53 = vpack.c.bf16 %v1157_v52, %v1156_v51 }
  0xe0   :  { %1457 = vmatprep.mubr.msk.f32.mxu1 %vm34_vm0, %v2027_v2 }
 0x1b2   :  { %v1417_v56 = vpop.f32.mrb[0].mxu1 }
 0x1b3   :  { %v211_v57 = vadd.f32 %v1417_v56, %v1128_v55  ;;  %v205_v58 = vpop.f32.mrb[1].mxu1 }
 0x1b4   :  { %v206_v59 = vadd.f32 %v1128_v55, %v205_v58  ;;  %v1159_v55 = vld [vmem:[%s2493_s4 + $0xc8] sm:$0xff]  ;;  %v1161_v58 = vld [vmem:[%s2493_s4 + $0xd8] sm:$0xff] }
 0x1b5   :  { %v215_v61 = vmax.f32 %v211_v57, 0.0  ;;  %v1797_v56 = vpack.c.bf16 %v1159_v55, %v1158_v54  ;;  %v1160_v57 = vld [vmem:[%s2493_s4 + $0xd0] sm:$0xff]  ;;  %v1188_v54 = vld [vmem:[%s2493_s4 + $0x100] sm:$0xff]  ;;  %v1189_v55 = vld [vmem:[%s2493_s4 + $0x108] sm:$0xff] }
 0x1b6   :  { %v214_v60 = vmax.f32 %v206_v59, 0.0  ;;  %v1801_v59 = vpack.c.bf16 %v1161_v58, %v1160_v57  ;;  %v1849_v57 = vpack.c.bf16 %v1189_v55, %v1188_v54  ;;  %v1191_v58 = vld [vmem:[%s2493_s4 + $0x118] sm:$0xff]  ;;  %v1212_v54 = vld [vmem:[%s2495_s6 + $0xb0] sm:$0xff] }
 0x1b7   :  { %v1213_v55 = vld [vmem:[%s2495_s6 + $0xb8] sm:$0xff] }
 0x1b8   :  { %1450 = vmatprep.mubr.f32.mxu0 %v214_v60  ;;  %v1162_v60 = vld [vmem:[%s2493_s4 + $0xe0] sm:$0xff] }
 0x1b9   :  { %1451 = vmatmul.mubr.f32.vlgmr.msra.gmra.mrb[2].mxu0 %v215_v61  ;;  %v1163_v61 = vld [vmem:[%s2493_s4 + $0xe8] sm:$0xff] }
 0x1ba   :  { %1752 = vmatpush3.bf16.msra.mxu0 %v1749_v11  ;;  %v1167_v11 = vld [vmem:[%s2494_s5 + $0x1] ss:$0 sm:$0xff] }
 0x1bb   :  { %1754 = vmatprep.subr.bf16.mxu0 %v1753_v14 }
 0x1be   :  { %1756 = vmatpush3.bf16.msra.mxu0 %v1753_v14 }
 0x1bf   :  { %1758 = vmatprep.subr.bf16.mxu0 %v1757_v17 }
 0x1c2   :  { %1760 = vmatpush3.bf16.msra.mxu0 %v1757_v17 }
 0x1c3   :  { %1762 = vmatprep.subr.bf16.mxu0 %v1761_v20 }
 0x1c6   :  { %1764 = vmatpush3.bf16.msra.mxu0 %v1761_v20 }
 0x1c7   :  { %1766 = vmatprep.subr.bf16.mxu0 %v1765_v23 }
 0x1ca   :  { %1768 = vmatpush3.bf16.msra.mxu0 %v1765_v23  ;;  %v1172_v23 = vld [vmem:[%s2491_s2 + $0x110] sm:$0xff] }
 0x1cb   :  { %1770 = vmatprep.subr.bf16.mxu0 %v1769_v26 }
 0x1ce   :  { %1772 = vmatpush3.bf16.msra.mxu0 %v1769_v26  ;;  %v1821_v26 = vpack.c.bf16 %v1173_v25, %v1172_v23  ;;  %v936_v23 = vld [vmem:[%s2495_s6] sm:$0xff]  ;;  %v1969_v25 = vmov 0.0|0.0  }
 0x1cf   :  { %1774 = vmatprep.subr.bf16.mxu0 %v1773_v29 }
 0x1d2   :  { %1776 = vmatpush3.bf16.msra.mxu0 %v1773_v29  ;;  %v1825_v29 = vpack.c.bf16 %v1175_v28, %v1174_v27  ;;  %v1205_v27 = vld [vmem:[%s2494_s5 + $0x2] ss:$0 sm:$0xff] }
 0x1d3   :  { %1778 = vmatprep.subr.bf16.mxu0 %v1777_v32 }
 0x1d6   :  { %1780 = vmatpush3.bf16.msra.mxu0 %v1777_v32  ;;  %v1829_v32 = vpack.c.bf16 %v1177_v31, %v1176_v30 }
 0x28c   :  { %v1452_v63 = vpop.f32.mrb[2].mxu0 }
 0x28d   :  { %v305_v0 = vpop.f32.mrb[3].mxu0  ;;  %v311_v1 = vadd.f32 %v1452_v63, %v1129_v62 }
 0x28e   :  { %v306_v3 = vadd.f32 %v1129_v62, %v305_v0  ;;  %v1805_v62 = vpack.c.bf16 %v1163_v61, %v1162_v60  ;;  %v1193_v60 = vld [vmem:[%s2493_s4 + $0x128] sm:$0xff] }
 0x28f   :  { %v315_v5 = vmax.f32 %v311_v1, 0.0  ;;  %v1164_v1 = vld [vmem:[%s2493_s4 + $0xf0] sm:$0xff] }
 0x290   :  { %v314_v4 = vmax.f32 %v306_v3, 0.0  ;;  %v1165_v3 = vld [vmem:[%s2493_s4 + $0xf8] sm:$0xff] }
 0x291   :  { %v317_v7 = vmul.f32 %v315_v5, %v315_v5 }
 0x292   :  { %v316_v6 = vmul.f32 %v314_v4, %v314_v4 }
 0x294   :  { %318 = vadd.xlane.f32.xlu0 %v316_v6 }
 0x298   :  { %320 = vadd.xlane.f32.xlu0 %v317_v7 }
 0x321   :  { %v319_v33 = vpop.xlane.xlu0 %318 }
 0x322   :  { %v322_v34 = vmax.f32 %v319_v33, 1e-24  ;;  %v1178_v33 = vld [vmem:[%s2491_s2 + $0x140] sm:$0xff] }
 0x324   :  { %1933 = vrsqrt.f32 %v322_v34  ;;  %v1179_v34 = vld [vmem:[%s2491_s2 + $0x148] sm:$0xff] }
 0x325   :  { %v321_v35 = vpop.xlane.xlu0 %320 }
 0x326   :  { %v323_v36 = vmax.f32 %v321_v35, 1e-24  ;;  %v1833_v35 = vpack.c.bf16 %v1179_v34, %v1178_v33 }
 0x328   :  { %1935 = vrsqrt.f32 %v323_v36  ;;  %v1180_v36 = vld [vmem:[%s2491_s2 + $0x150] sm:$0xff] }
 0x32e   :  { %v1934_v37 = vpop.eup %1933 }
 0x32f   :  { %v326_v39 = vmul.f32 %v1934_v37, %v314_v4  ;;  %v1809_v4 = vpack.c.bf16 %v1165_v3, %v1164_v1  ;;  %v1181_v37 = vld [vmem:[%s2491_s2 + $0x158] sm:$0xff]  ;;  %v1196_v1 = vld [vmem:[%s2493_s4 + $0x140] sm:$0xff]  ;;  %v1197_v3 = vld [vmem:[%s2493_s4 + $0x148] sm:$0xff] }
 0x332   :  { %v1936_v38 = vpop.eup %1935 }
 0x333   :  { %v327_v40 = vmul.f32 %v1936_v38, %v315_v5  ;;  %v1149_v5 = vld [vmem:[%s2492_s3 + $0x1] ss:$0 sm:$0xff]  ;;  %v1837_v38 = vpack.c.bf16 %v1181_v37, %v1180_v36  ;;  %v1207_v37 = vld [vmem:[%s2495_s6 + $0x88] sm:$0xff] }
 0x334   :  { %v1206_v36 = vld [vmem:[%s2495_s6 + $0x80] sm:$0xff] }
 0x335   :  { %v1745_v41 = vpack.c.bf16 %v327_v40, %v326_v39  ;;  %v1182_v39 = vld [vmem:[%s2491_s2 + $0x160] sm:$0xff]  ;;  %v1183_v40 = vld [vmem:[%s2491_s2 + $0x168] sm:$0xff] }
 0x337   :  { %1746 = vmatprep.subr.bf16.mxu1 %v1745_v41 }
 0x338   :  { %1748 = vmatpush3.bf16.msra.mxu1 %v1745_v41  ;;  %v1841_v41 = vpack.c.bf16 %v1183_v40, %v1182_v39  ;;  %v938_v39 = vld [vmem:[%s2495_s6 + $0x10] sm:$0xff]  ;;  %v939_v40 = vld [vmem:[%s2495_s6 + $0x18] sm:$0xff] }
 0x339   :  { %1782 = vmatprep.subr.bf16.mxu1 %v1781_v45 }
 0x33b   :  { %1458 = vmatmul.mubr.msk.f32.vlgmr.msra.gmra.mrb[2].mxu1 %vm34_vm0, %v2052_v12 }
 0x33c   :  { %1784 = vmatpush3.bf16.msra.mxu1 %v1781_v45 }
 0x33d   :  { %1786 = vmatprep.subr.bf16.mxu1 %v1785_v47 }
 0x340   :  { %1788 = vmatpush3.bf16.msra.mxu1 %v1785_v47 }
 0x341   :  { %1790 = vmatprep.subr.bf16.mxu1 %v1789_v50 }
 0x344   :  { %1792 = vmatpush3.bf16.msra.mxu1 %v1789_v50 }
 0x345   :  { %1794 = vmatprep.subr.bf16.mxu1 %v1793_v53 }
 0x348   :  { %1796 = vmatpush3.bf16.msra.mxu1 %v1793_v53 }
 0x349   :  { %1798 = vmatprep.subr.bf16.mxu1 %v1797_v56 }
 0x34c   :  { %1800 = vmatpush3.bf16.msra.mxu1 %v1797_v56  ;;  %v1190_v56 = vld [vmem:[%s2493_s4 + $0x110] sm:$0xff] }
 0x34d   :  { %1802 = vmatprep.subr.bf16.mxu1 %v1801_v59 }
 0x350   :  { %1804 = vmatpush3.bf16.msra.mxu1 %v1801_v59  ;;  %v1853_v59 = vpack.c.bf16 %v1191_v58, %v1190_v56  ;;  %v1891_v56 = vpack.c.bf16 %v1213_v55, %v1212_v54  ;;  %v945_v58 = vld [vmem:[%s2495_s6 + $0x48] sm:$0xff] }
 0x351   :  { %1806 = vmatprep.subr.bf16.mxu1 %v1805_v62 }
 0x354   :  { %1808 = vmatpush3.bf16.msra.mxu1 %v1805_v62  ;;  %v1194_v62 = vld [vmem:[%s2493_s4 + $0x130] sm:$0xff] }
 0x355   :  { %1810 = vmatprep.subr.bf16.mxu1 %v1809_v4 }
 0x358   :  { %1812 = vmatpush3.bf16.msra.mxu1 %v1809_v4  ;;  %v1865_v4 = vpack.c.bf16 %v1197_v3, %v1196_v1  ;;  %v1217_v3 = vld [vmem:[%s2495_s6 + $0xd8] sm:$0xff] }
 0x359   :  { %1818 = vmatprep.subr.bf16.mxu1 %v1817_v24 }
 0x40e   :  { %v1459_v63 = vpop.f32.mrb[2].mxu1 }
 0x40f   :  { %v394_v0 = vpop.f32.mrb[3].mxu1 }
 0x410   :  { %1492 = vmatprep.mubr.f32.mxu0 %v394_v0 }
 0x411   :  { %1493 = vmatmul.mubr.f32.vlgmr.msra.gmra.mrb[4].mxu0 %v1459_v63  ;;  %v1195_v63 = vld [vmem:[%s2493_s4 + $0x138] sm:$0xff] }
 0x412   :  { %1534 = vmatprep.mubr.msk.f32.mxu0 %vm34_vm0, %v2027_v2  ;;  %v1861_v0 = vpack.c.bf16 %v1195_v63, %v1194_v62  ;;  %v946_v62 = vld [vmem:[%s2495_s6 + $0x50] sm:$0xff]  ;;  %v947_v63 = vld [vmem:[%s2495_s6 + $0x58] sm:$0xff] }
 0x413   :  { %v1921_v1 = vpack.c.bf16 %v947_v63, %v946_v62 }
 0x4e4   :  { %v1494_v6 = vpop.f32.mrb[4].mxu0 }
 0x4e5   :  { %v500_v7 = vadd.f32 %v1494_v6, %v1149_v5  ;;  %v494_v8 = vpop.f32.mrb[5].mxu0  ;;  %v1199_v6 = vld [vmem:[%s2493_s4 + $0x158] sm:$0xff] }
 0x4e6   :  { %v495_v9 = vadd.f32 %v1149_v5, %v494_v8  ;;  %v1198_v5 = vld [vmem:[%s2493_s4 + $0x150] sm:$0xff]  ;;  %v1200_v8 = vld [vmem:[%s2493_s4 + $0x160] sm:$0xff] }
 0x4e7   :  { %v504_v10 = vmax.f32 %v500_v7, 0.0  ;;  %v1869_v7 = vpack.c.bf16 %v1199_v6, %v1198_v5  ;;  %v949_v5 = vld [vmem:[%s2495_s6 + $0x68] sm:$0xff]  ;;  %v1971_v6 = vmov 0.0  }
 0x4e8   :  { %v503_v2 = vmax.f32 %v495_v9, 0.0  ;;  %v1201_v9 = vld [vmem:[%s2493_s4 + $0x168] sm:$0xff] }
 0x4ea   :  { %1527 = vmatprep.mubr.f32.mxu1 %v503_v2  ;;  %v1873_v2 = vpack.c.bf16 %v1201_v9, %v1200_v8  ;;  %v1218_v8 = vld [vmem:[%s2495_s6 + $0xe0] sm:$0xff]  ;;  %v1219_v9 = vld [vmem:[%s2495_s6 + $0xe8] sm:$0xff] }
 0x4eb   :  { %1528 = vmatmul.mubr.f32.vlgmr.msra.gmra.mrb[4].mxu1 %v504_v10 }
 0x4ec   :  { %1820 = vmatpush3.bf16.msra.mxu1 %v1817_v24  ;;  %v937_v24 = vld [vmem:[%s2495_s6 + $0x8] sm:$0xff] }
 0x4ed   :  { %1822 = vmatprep.subr.bf16.mxu1 %v1821_v26 }
 0x4f0   :  { %1824 = vmatpush3.bf16.msra.mxu1 %v1821_v26  ;;  %v1906_v26 = vpack.c.bf16 %v937_v24, %v936_v23 }
 0x4f1   :  { %1826 = vmatprep.subr.bf16.mxu1 %v1825_v29 }
 0x4f4   :  { %1828 = vmatpush3.bf16.msra.mxu1 %v1825_v29 }
 0x4f5   :  { %1830 = vmatprep.subr.bf16.mxu1 %v1829_v32 }
 0x4f8   :  { %1832 = vmatpush3.bf16.msra.mxu1 %v1829_v32 }
 0x4f9   :  { %1834 = vmatprep.subr.bf16.mxu1 %v1833_v35 }
 0x4fc   :  { %1836 = vmatpush3.bf16.msra.mxu1 %v1833_v35 }
 0x4fd   :  { %1838 = vmatprep.subr.bf16.mxu1 %v1837_v38 }
 0x500   :  { %1840 = vmatpush3.bf16.msra.mxu1 %v1837_v38  ;;  %v1882_v38 = vpack.c.bf16 %v1207_v37, %v1206_v36 }
 0x501   :  { %1842 = vmatprep.subr.bf16.mxu1 %v1841_v41 }
 0x504   :  { %1844 = vmatpush3.bf16.msra.mxu1 %v1841_v41  ;;  %v1909_v41 = vpack.c.bf16 %v939_v40, %v938_v39 }
 0x505   :  { %1846 = vmatprep.subr.bf16.mxu1 %v1845_v44 }
 0x508   :  { %1848 = vmatpush3.bf16.msra.mxu1 %v1845_v44  ;;  %v1885_v44 = vpack.c.bf16 %v1209_v43, %v1208_v42 }
 0x509   :  { %1881 = vmatprep.subr.bf16.mxu1 %v1969_v25 }
 0x5be   :  { %v1529_v13 = vpop.f32.mrb[4].mxu1 }
 0x5bf   :  { %v596_v14 = vpop.f32.mrb[5].mxu1  ;;  %v602_v15 = vadd.f32 %v1529_v13, %v1167_v11  ;;  %v1202_v13 = vld [vmem:[%s2493_s4 + $0x170] sm:$0xff] }
 0x5c0   :  { %v597_v16 = vadd.f32 %v1167_v11, %v596_v14  ;;  %v1203_v14 = vld [vmem:[%s2493_s4 + $0x178] sm:$0xff] }
 0x5c1   :  { %v606_v18 = vmax.f32 %v602_v15, 0.0  ;;  %v1877_v15 = vpack.c.bf16 %v1203_v14, %v1202_v13  ;;  %v1900_v13 = vpack.c.bf16 %v1219_v9, %v1218_v8  ;;  %v1220_v14 = vld [vmem:[%s2495_s6 + $0xf0] sm:$0xff] }
 0x5c2   :  { %v605_v17 = vmax.f32 %v597_v16, 0.0  ;;  %v1187_v16 = vld [vmem:[%s2492_s3 + $0x2] ss:$0 sm:$0xff] }
 0x5c3   :  { %v608_v20 = vmul.f32 %v606_v18, %v606_v18 }
 0x5c4   :  { %v607_v19 = vmul.f32 %v605_v17, %v605_v17 }
 0x5c6   :  { %609 = vadd.xlane.f32.xlu1 %v607_v19 }
 0x5ca   :  { %611 = vadd.xlane.f32.xlu1 %v608_v20 }
 0x653   :  { %v610_v45 = vpop.xlane.xlu1 %609 }
 0x654   :  { %v613_v46 = vmax.f32 %v610_v45, 1e-24  ;;  %v940_v45 = vld [vmem:[%s2495_s6 + $0x20] sm:$0xff] }
 0x656   :  { %1937 = vrsqrt.f32 %v613_v46  ;;  %v941_v46 = vld [vmem:[%s2495_s6 + $0x28] sm:$0xff] }
 0x657   :  { %v612_v47 = vpop.xlane.xlu1 %611 }
 0x658   :  { %v614_v48 = vmax.f32 %v612_v47, 1e-24  ;;  %v1912_v47 = vpack.c.bf16 %v941_v46, %v940_v45 }
 0x65a   :  { %1939 = vrsqrt.f32 %v614_v48  ;;  %v1210_v48 = vld [vmem:[%s2495_s6 + $0xa0] sm:$0xff] }
 0x660   :  { %v1938_v49 = vpop.eup %1937 }
 0x661   :  { %v617_v51 = vmul.f32 %v1938_v49, %v605_v17  ;;  %v1211_v49 = vld [vmem:[%s2495_s6 + $0xa8] sm:$0xff] }
 0x664   :  { %v1940_v50 = vpop.eup %1939 }
 0x665   :  { %v618_v52 = vmul.f32 %v1940_v50, %v606_v18  ;;  %v1888_v50 = vpack.c.bf16 %v1211_v49, %v1210_v48 }
 0x667   :  { %v1813_v53 = vpack.c.bf16 %v618_v52, %v617_v51  ;;  %v942_v51 = vld [vmem:[%s2495_s6 + $0x30] sm:$0xff]  ;;  %v943_v52 = vld [vmem:[%s2495_s6 + $0x38] sm:$0xff] }
 0x669   :  { %1814 = vmatprep.subr.bf16.mxu0 %v1813_v53 }
 0x66a   :  { %1816 = vmatpush3.bf16.msra.mxu0 %v1813_v53  ;;  %v1915_v53 = vpack.c.bf16 %v943_v52, %v942_v51 }
 0x66b   :  { %1850 = vmatprep.subr.bf16.mxu0 %v1849_v57 }
 0x66d   :  { %1535 = vmatmul.mubr.msk.f32.vlgmr.msra.gmra.mrb[6].mxu0 %vm34_vm0, %v2052_v12  ;;  %v1192_v12 = vld [vmem:[%s2493_s4 + $0x120] sm:$0xff] }
 0x66e   :  { %1852 = vmatpush3.bf16.msra.mxu0 %v1849_v57  ;;  %v1857_v61 = vpack.c.bf16 %v1193_v60, %v1192_v12  ;;  %v944_v57 = vld [vmem:[%s2495_s6 + $0x40] sm:$0xff]  ;;  %v1215_v60 = vld [vmem:[%s2495_s6 + $0xc8] sm:$0xff] }
 0x66f   :  { %1854 = vmatprep.subr.bf16.mxu0 %v1853_v59  ;;  %v1214_v12 = vld [vmem:[%s2495_s6 + $0xc0] sm:$0xff] }
 0x672   :  { %1856 = vmatpush3.bf16.msra.mxu0 %v1853_v59  ;;  %v1918_v59 = vpack.c.bf16 %v945_v58, %v944_v57 }
 0x673   :  { %1858 = vmatprep.subr.bf16.mxu0 %v1857_v61 }
 0x676   :  { %1860 = vmatpush3.bf16.msra.mxu0 %v1857_v61  ;;  %v1894_v61 = vpack.c.bf16 %v1215_v60, %v1214_v12 }
 0x677   :  { %1862 = vmatprep.subr.bf16.mxu0 %v1861_v0 }
 0x67a   :  { %1864 = vmatpush3.bf16.msra.mxu0 %v1861_v0  ;;  %v1216_v0 = vld [vmem:[%s2495_s6 + $0xd0] sm:$0xff] }
 0x67b   :  { %1866 = vmatprep.subr.bf16.mxu0 %v1865_v4 }
 0x67e   :  { %1868 = vmatpush3.bf16.msra.mxu0 %v1865_v4  ;;  %v948_v4 = vld [vmem:[%s2495_s6 + $0x60] sm:$0xff] }
 0x67f   :  { %1870 = vmatprep.subr.bf16.mxu0 %v1869_v7 }
 0x682   :  { %1872 = vmatpush3.bf16.msra.mxu0 %v1869_v7  ;;  %v1897_v7 = vpack.c.bf16 %v1217_v3, %v1216_v0 }
 0x683   :  { %1874 = vmatprep.subr.bf16.mxu0 %v1873_v2 }
 0x686   :  { %1876 = vmatpush3.bf16.msra.mxu0 %v1873_v2  ;;  %v1924_v2 = vpack.c.bf16 %v949_v5, %v948_v4 }
 0x687   :  { %1878 = vmatprep.subr.bf16.mxu0 %v1877_v15 }
 0x68a   :  { %1880 = vmatpush3.bf16.msra.mxu0 %v1877_v15  ;;  %v1221_v15 = vld [vmem:[%s2495_s6 + $0xf8] sm:$0xff] }
 0x68b   :  { %1905 = vmatprep.subr.bf16.mxu0 %v1969_v25 }
 0x740   :  { %v1536_v10 = vpop.f32.mrb[6].mxu0 }
 0x741   :  { %v685_v11 = vpop.f32.mrb[7].mxu0 }
 0x742   :  { %1569 = vmatprep.mubr.f32.mxu1 %v685_v11  ;;  %v951_v11 = vld [vmem:[%s2495_s6 + $0x78] sm:$0xff] }
 0x743   :  { %1570 = vmatmul.mubr.f32.vlgmr.msra.gmra.mrb[6].mxu1 %v1536_v10  ;;  %v950_v10 = vld [vmem:[%s2495_s6 + $0x70] sm:$0xff] }
 0x744   :  { %1883 = vmatpush3.bf16.msra.mxu1 %v1882_v38  ;;  %1639 = vmatprep.mubr.msk.f32.mxu1 %vm1970_vm1, %v1971_v6 }
 0x745   :  { %1884 = vmatprep.subr.bf16.mxu1 %v1969_v25 }
 0x748   :  { %1886 = vmatpush3.bf16.msra.mxu1 %v1885_v44  ;;  %v1109_v44 = vld [vmem:[%s2496_s7] sm:$0x1] }
 0x749   :  { %1887 = vmatprep.subr.bf16.mxu1 %v1969_v25 }
 0x74c   :  { %1889 = vmatpush3.bf16.msra.mxu1 %v1888_v50 }
 0x74d   :  { %1890 = vmatprep.subr.bf16.mxu1 %v1969_v25 }
 0x750   :  { %1892 = vmatpush3.bf16.msra.mxu1 %v1891_v56 }
 0x751   :  { %1893 = vmatprep.subr.bf16.mxu1 %v1969_v25 }
 0x754   :  { %1895 = vmatpush3.bf16.msra.mxu1 %v1894_v61 }
 0x755   :  { %1896 = vmatprep.subr.bf16.mxu1 %v1969_v25 }
 0x758   :  { %1898 = vmatpush3.bf16.msra.mxu1 %v1897_v7 }
 0x759   :  { %1899 = vmatprep.subr.bf16.mxu1 %v1969_v25 }
 0x75c   :  { %1901 = vmatpush3.bf16.msra.mxu1 %v1900_v13 }
 0x75d   :  { %1902 = vmatprep.subr.bf16.mxu1 %v1969_v25 }
 0x816   :  { %v1571_v17 = vpop.f32.mrb[6].mxu1 }
 0x817   :  { %v791_v18 = vadd.f32 %v1571_v17, %v1187_v16  ;;  %v785_v19 = vpop.f32.mrb[7].mxu1  ;;  %v1903_v17 = vpack.c.bf16 %v1221_v15, %v1220_v14 }
 0x818   :  { %v786_v20 = vadd.f32 %v1187_v16, %v785_v19  ;;  %v1927_v16 = vpack.c.bf16 %v951_v11, %v950_v10 }
 0x819   :  { %v795_v22 = vmax.f32 %v791_v18, 0.0  ;;  %1904 = vmatpush3.bf16.msra.mxu1 %v1903_v17 }
 0x81a   :  { %v794_v21 = vmax.f32 %v786_v20, 0.0 }
 0x81c   :  { %1604 = vmatprep.mubr.f32.mxu0 %v794_v21 }
 0x81d   :  { %1605 = vmatmul.mubr.f32.vlgmr.msra.gmra.mrb[8].mxu0 %v795_v22 }
 0x81e   :  { %1907 = vmatpush3.bf16.msra.mxu0 %v1906_v26  ;;  %1674 = vmatprep.mubr.msk.f32.mxu0 %vm1970_vm1, %v1971_v6 }
 0x81f   :  { %1908 = vmatprep.subr.bf16.mxu0 %v1969_v25 }
 0x822   :  { %1910 = vmatpush3.bf16.msra.mxu0 %v1909_v41 }
 0x823   :  { %1911 = vmatprep.subr.bf16.mxu0 %v1969_v25 }
 0x826   :  { %1913 = vmatpush3.bf16.msra.mxu0 %v1912_v47 }
 0x827   :  { %1914 = vmatprep.subr.bf16.mxu0 %v1969_v25 }
 0x82a   :  { %1916 = vmatpush3.bf16.msra.mxu0 %v1915_v53 }
 0x82b   :  { %1917 = vmatprep.subr.bf16.mxu0 %v1969_v25 }
 0x82e   :  { %1919 = vmatpush3.bf16.msra.mxu0 %v1918_v59 }
 0x82f   :  { %1920 = vmatprep.subr.bf16.mxu0 %v1969_v25 }
 0x832   :  { %1922 = vmatpush3.bf16.msra.mxu0 %v1921_v1 }
 0x833   :  { %1923 = vmatprep.subr.bf16.mxu0 %v1969_v25 }
 0x836   :  { %1925 = vmatpush3.bf16.msra.mxu0 %v1924_v2 }
 0x837   :  { %1926 = vmatprep.subr.bf16.mxu0 %v1969_v25 }
 0x83a   :  { %1928 = vmatpush3.bf16.msra.mxu0 %v1927_v16 }
 0x8f0   :  { %v1606_v28 = vpop.f32.mrb[8].mxu0 }
 0x8f1   :  { %v893_v29 = vadd.f32 %v1606_v28, %v1205_v27  ;;  %v887_v30 = vpop.f32.mrb[9].mxu0 }
 0x8f2   :  { %v888_v31 = vadd.f32 %v1205_v27, %v887_v30 }
 0x8f3   :  { %v2361_v32 = vmax.f32 %v893_v29, 0.0 }
 0x8f4   :  { %v2363_v33 = vmax.f32 %v888_v31, 0.0 }
 0x8f5   :  { %v899_v34 = vmul.f32 %v2361_v32, %v2361_v32 }
 0x8f6   :  { %v898_v35 = vmul.f32 %v2363_v33, %v2363_v33 }
 0x8f7   :  { %902 = vadd.xlane.f32.xlu1 %v899_v34 }
 0x8f8   :  { %900 = vadd.xlane.f32.xlu0 %v898_v35 }
 0x984   :  { %v903_v18 = vpop.xlane.xlu1 %902 }
 0x985   :  { %v905_v19 = vmax.f32 %v903_v18, 1e-24  ;;  %v901_v20 = vpop.xlane.xlu0 %900 }
 0x986   :  { %v904_v21 = vmax.f32 %v901_v20, 1e-24 }
 0x987   :  { %1941 = vrsqrt.f32 %v905_v19 }
 0x988   :  { %1943 = vrsqrt.f32 %v904_v21 }
 0x991   :  { %v1942_v22 = vpop.eup %1941 }
 0x992   :  { %v1944_v23 = vpop.eup %1943  ;;  %v909_v24 = vmul.f32 %v1942_v22, %v2361_v32 }
 0x993   :  { %v908_v26 = vmul.f32 %v1944_v23, %v2363_v33 }
 0x995   :  { %v921_v27 = vmax.f32 %v908_v26, %v909_v24  ;;  %v928_v28 = vadd.f32 %v909_v24, %v908_v26 }
 0x997   :  { %v922_v29 = vrot.slane %v921_v27, 4  ;;  %v929_v30 = vrot.slane %v928_v28, 4 }
 0x999   :  { %v923_v31 = vmax.f32 %v921_v27, %v922_v29  ;;  %v930_v25 = vadd.f32 %v929_v30, %v928_v28 }
 0x99b   :  { %v924_v34 = vrot.slane %v923_v31, 2  ;;  %v931_v35 = vrot.slane %v930_v25, 2 }
 0x99d   :  { %v925_v36 = vmax.f32 %v923_v31, %v924_v34  ;;  %v932_v37 = vadd.f32 %v931_v35, %v930_v25 }
 0x99f   :  { %v926_v38 = vrot.slane %v925_v36, 1  ;;  %v933_v39 = vrot.slane %v932_v37, 1 }
 0x9a1   :  { %v927_v40 = vmax.f32 %v925_v36, %v926_v38  ;;  %v934_v41 = vadd.f32 %v933_v39, %v932_v37 }
 0x9a3   :  { %1675 = vmatmul.mubr.f32.vlgmr.msra.gmra.mrb[10].mxu0 %v927_v40  ;;  %v935_v42 = vmul.f32 0.0625, %v934_v41 }
 0x9a5   :  { %1640 = vmatmul.mubr.f32.vlgmr.msra.gmra.mrb[8].mxu1 %v935_v42 }
 0xa76   :  { %v1105_v32 = vpop.f32.mrb[10].mxu0 }
 0xa77   :  { %v1676_v43 = vpop.f32.mrb[11].mxu0 }
 0xa78   :  { %v1035_v33 = vpop.f32.mrb[8].mxu1 }
 0xa79   :  { %v1106_v45 = vadd.f32 %v1105_v32, %v1035_v33  ;;  %v1641_v46 = vpop.f32.mrb[9].mxu1 }
 0xa7b   :  { %v1110_v47 = vadd.f32 %v1109_v44, %v1106_v45 }
 0xa7d   :  { %1111 = vst [vmem:[#allocation2] sm:$0x1] %v1110_v47 }
 0xa7e   :  { %1956 = shalt.err (!%p1953_p4)
}
 0xa7f   :  { %s1957_s11 = scalar_lea.hbm %s2497_s8, 16 }
 0xa80   :  { %p1958_p5 = scmp.ne.s32.totalorder %s2497_s8, %s1957_s11  ;;  %p1961_p6 = scmp.lt.u32.totalorder %s1957_s11, %s2497_s8 }
 0xa82   :  { %p1963_p7 = pnand %p1961_p6, %p1958_p5 }
 0xa84   :  { %1966 = shalt.err (!%p1963_p7)
}
 0xa85   :  { %1121 = dma.vmem_to_hbm [thread:$0]  %s1119_s28, 16, %s2497_s8, [#allocation3]  }
 0xa86   :  { %1967 = dma.done.wait [#allocation3], 16  }
 0xa87   :  { %1968 = vsyncadd [#allocation3], 4294967280 }
 0xa88   :  { %1125 = vsyncpa [#allocation3], 1 }

</bundles_post_ra>
